<compile_context>
chip_gen: v7x
topology: tpu7x:2x2x1
jax: 0.10.0
libtpu: 0.0.40
codegen_flags: <defaults>
</compile_context>

<pallas_src>
import functools
import math

import jax
import jax.numpy as jnp
from jax.experimental import pallas as pl
from jax.experimental.pallas import tpu as pltpu

_LANES = 1024                          # lane-dense last dim (multiple of 128)
_TARGET_BLOCK_BYTES = 2 * 1024 * 1024  # ~2 MiB per block
_MIN_SPLIT_BLOCK_BYTES = 512 * 1024    # don't split below ~512 KiB blocks


def _leaky_relu_kernel(x_ref, o_ref, *, negative_slope: float):
    x = x_ref[...]
    # leaky_relu(x) = x if x >= 0 else negative_slope * x
    o_ref[...] = jnp.where(x >= 0, x, x * jnp.asarray(negative_slope, x.dtype))


def _round_up(n: int, m: int) -> int:
    return ((n + m - 1) // m) * m


def _sublane_multiple(itemsize: int) -> int:
    # f32 packs 8 rows / vreg, bf16 16, int8/fp8 32.
    return {4: 8, 2: 16, 1: 32}.get(itemsize, 8)


@functools.partial(jax.jit, static_argnames=("negative_slope",))
def leaky_relu(x: jax.Array, negative_slope: float) -> jax.Array:
    """Elementwise LeakyReLU matching torch.nn.functional.leaky_relu."""
    orig_shape = x.shape
    total = math.prod(orig_shape) if orig_shape else 1
    itemsize = jnp.dtype(x.dtype).itemsize
    sublane = _sublane_multiple(itemsize)

    # Lane-dense 2D layout (rows, 1024); pad only to the next lane multiple.
    rows = pl.cdiv(total, _LANES)
    padded_total = rows * _LANES

    flat = x.reshape(total)
    if padded_total != total:
        flat = jnp.pad(flat, (0, padded_total - total))
    x2d = flat.reshape(rows, _LANES)

    # Byte-budgeted block rows (512 f32 / 1024 bf16 / 2048 int8).
    budget_rows = max(
        sublane, (_TARGET_BLOCK_BYTES // (_LANES * itemsize)) // sublane * sublane
    )
    block_rows = min(budget_rows, rows)

    # Single-block tensors big enough to split -> 2 blocks so the v7x
    # megacore can shard the "parallel" grid axis across both TensorCores.
    if block_rows == rows:
        half = _round_up(pl.cdiv(rows, 2), sublane)
        if half < rows and half * _LANES * itemsize >= _MIN_SPLIT_BLOCK_BYTES:
            block_rows = half

    grid = (pl.cdiv(rows, block_rows),)
    kernel = functools.partial(_leaky_relu_kernel, negative_slope=negative_slope)

    out2d = pl.pallas_call(
        kernel,
        out_shape=jax.ShapeDtypeStruct((rows, _LANES), x.dtype),
        grid=grid,
        in_specs=[pl.BlockSpec((block_rows, _LANES), lambda i: (i, 0))],
        out_specs=pl.BlockSpec((block_rows, _LANES), lambda i: (i, 0)),
        compiler_params=pltpu.CompilerParams(
            dimension_semantics=("parallel",),
        ),
    )(x2d)

    out_flat = out2d.reshape(padded_total)
    if padded_total != total:
        out_flat = out_flat[:total]
    return out_flat.reshape(orig_shape)


class LeakyReLU:
    """JAX/Pallas equivalent of the PyTorch LeakyReLU module."""

    def __init__(self, negative_slope: float) -> None:
        self.negative_slope = negative_slope

    def __call__(self, tensor: jax.Array) -> jax.Array:
        return leaky_relu(tensor, negative_slope=self.negative_slope)


if __name__ == "__main__":
    key = jax.random.PRNGKey(0)
    # NCHW, consistent with typical ESRGAN feature maps (small synthetic shape).
    x = jax.random.normal(key, (2, 4, 16, 16), dtype=jnp.float32)

    module = LeakyReLU(negative_slope=0.2)
    y = module(x)
    y = jax.block_until_ready(y)

    # Reference check (plain JAX).
    y_ref = jnp.where(x >= 0, x, 0.2 * x)
    assert y.shape == x.shape and y.dtype == x.dtype
    assert jnp.allclose(y, y_ref, atol=0.0, rtol=0.0), "mismatch vs reference"

    # Also exercise a shape that does NOT divide 1024 (ragged final block).
    x2 = jax.random.normal(jax.random.PRNGKey(1), (3, 5, 17, 13), dtype=jnp.float32)
    y2 = jax.block_until_ready(module(x2))
    y2_ref = jnp.where(x2 >= 0, x2, 0.2 * x2)
    assert jnp.allclose(y2, y2_ref, atol=0.0, rtol=0.0), "mismatch vs reference (ragged)"

    print("KERNEL_OK")
</pallas_src>

<mosaic_0001>
module attributes {stable_mosaic.version = 11 : i64} {
  func.func @_leaky_relu_kernel(%arg0: i32, %arg1: memref<2x1024xf32, #tpu.memory_space<vmem>>, %arg2: memref<2x1024xf32, #tpu.memory_space<vmem>>) attributes {dimension_semantics = [#tpu.dimension_semantics<parallel>], iteration_bounds = array<i64: 1>, scalar_prefetch = 0 : i64, scratch_operands = 0 : i64, tpu.core_type = #tpu.core_type<tc>, window_params = [{transform_indices = @transform_0, window_bounds = array<i64: 2, 1024>}, {transform_indices = @transform_1, window_bounds = array<i64: 2, 1024>}]} {
    %c0 = arith.constant 0 : index
    %c0_0 = arith.constant 0 : index
    %0 = vector.load %arg1[%c0, %c0_0] : memref<2x1024xf32, #tpu.memory_space<vmem>>, vector<2x1024xf32>
    %cst = arith.constant 0.000000e+00 : f32
    %1 = vector.broadcast %cst : f32 to vector<2x1024xf32>
    %2 = arith.cmpf oge, %0, %1 : vector<2x1024xf32>
    %cst_1 = arith.constant 2.000000e-01 : f32
    %3 = vector.broadcast %cst_1 : f32 to vector<2x1024xf32>
    %4 = arith.mulf %0, %3 : vector<2x1024xf32>
    %5 = arith.select %2, %0, %4 : vector<2x1024xi1>, vector<2x1024xf32>
    %c0_2 = arith.constant 0 : index
    %c0_3 = arith.constant 0 : index
    %6 = vector.load %arg2[%c0_2, %c0_3] : memref<2x1024xf32, #tpu.memory_space<vmem>>, vector<2x1024xf32>
    tpu.vector_store %arg2[%c0_2, %c0_3], %5 {strides = array<i32>} : memref<2x1024xf32, #tpu.memory_space<vmem>>, vector<2x1024xf32>,
    return
  }
  func.func @transform_0(%arg0: i32) -> (i32, i32) {
    %c0_i32 = arith.constant 0 : i32
    %c0_i32_0 = arith.constant 0 : i32
    return %arg0, %c0_i32 : i32, i32
  }
  func.func @transform_1(%arg0: i32) -> (i32, i32) {
    %c0_i32 = arith.constant 0 : i32
    %c0_i32_0 = arith.constant 0 : i32
    return %arg0, %c0_i32 : i32, i32
  }
}

</mosaic_0001>

<bundles_post_ra>
// kernel: leaky_relu.1
= control target key start
LH: loop header
LB: loop body
LE: loop exit
PB: predicated region body
PF: predicated region fallthrough
CT: control target
= control target key end

     0   :  { %s44_s0 = inlined_call_operand.vmem [shape: f32[2,1024], index: 0, kind: input, shape index: {}]   ;;  %s45_s1 = inlined_call_operand.vmem [shape: f32[2,1024], index: 1, kind: output, shape index: {}]  }
   0x1   :  { %v8_v0 = vld [vmem:[%s44_s0] sm:$0xff]  ;;  %v9_v1 = vld [vmem:[%s44_s0 + $0x8] sm:$0xff] }
   0x2   :  { %vm10_vm0 = vcmp.ge.f32.partialorder %v8_v0, 0.0  ;;  %v12_v2 = vmul.f32 0.2, %v8_v0  ;;  %vm11_vm1 = vcmp.ge.f32.partialorder %v9_v1, 0.0  ;;  %v13_v3 = vmul.f32 0.2, %v9_v1 }
   0x4   :  { %v14_v4 = vsel %vm10_vm0, %v8_v0, %v12_v2  ;;  %v15_v5 = vsel %vm11_vm1, %v9_v1, %v13_v3 }
   0x5   :  { %16 = vst [vmem:[%s45_s1] sm:$0xff] %v14_v4  ;;  %17 = vst [vmem:[%s45_s1 + $0x8] sm:$0xff] %v15_v5 }

</bundles_post_ra>
